<compile_context>
chip_gen: v6e
topology: v6e:2x2x1
jax: 0.10.0
libtpu: 0.0.40
codegen_flags: <defaults>
</compile_context>

<pallas_src>
import functools

import jax
import jax.numpy as jnp
from jax import lax
from jax.experimental import pallas as pl
from jax.experimental.pallas import tpu as pltpu

SUBLANES = 8
LANES = 128


def _cdiv(a, b):
    return -(-a // b)


def _tpu_defaults():
    """Per-generation (max_tile_c, min_grid)."""
    try:
        kind = jax.devices()[0].device_kind.lower()
    except Exception:
        return 16384, 1
    if "v5 lite" in kind or "v5e" in kind or "v5lite" in kind:
        # v5e: 16 MiB default scoped VMEM -> keep 512 KiB-per-plane tiles.
        return 16384, 1
    if "v7" in kind:
        # v7x: 2 TensorCores per chip -> keep at least 2 parallel grid steps.
        return 32768, 2
    # v6e and newer single-core parts: 1 MiB-per-plane tiles.
    return 32768, 1


def _choose_layout(n, max_tile_c, min_grid):
    """Pad/reshape plan: N 1-D elements -> (8, C) plane tiled as (8, TILE_C)."""
    c = _cdiv(max(int(n), 1), SUBLANES)
    c = _cdiv(c, LANES) * LANES                  # lane-align
    grid = _cdiv(c, max_tile_c)
    if c >= min_grid * LANES:
        grid = max(grid, min_grid)               # megacore sharding on v7x
    tile_c = _cdiv(_cdiv(c, grid), LANES) * LANES
    c = grid * tile_c
    n_pad = SUBLANES * c
    return n_pad, c, tile_c, grid


def _pack_input_slab(pred, target, n_pad, c):
    """(N,2)+(N,2) -> one (32, C) slab: rows 0-7 ps, 8-15 pe, 16-23 ts, 24-31 te."""
    n = pred.shape[0]
    pt = jnp.concatenate([jnp.asarray(pred, jnp.float32),
                          jnp.asarray(target, jnp.float32)], axis=1)   # (N, 4)
    pt = jnp.pad(pt, ((0, n_pad - n), (0, 0)))                         # (n_pad, 4)
    return pt.T.reshape(4 * SUBLANES, c)


def _pack_weight_slab(weight, n, n_pad, c):
    """weight (N,), (N,1) or (N,2) -> (16, C) slab: rows 0-7 w_center, 8-15 w_interval."""
    w = jnp.asarray(weight, jnp.float32)
    if w.ndim == 1:
        w = w[:, None]
    w2 = jnp.broadcast_to(w, (n, 2))
    w2 = jnp.pad(w2, ((0, n_pad - n), (0, 0)))                          # (n_pad, 2)
    return w2.T.reshape(2 * SUBLANES, c)


def _recip(x):
    """1/x via EUP approx reciprocal + one Newton step (≈ f32 accurate)."""
    r = pl.reciprocal(x, approx=True)
    return r * (2.0 - x * r)


def _bounded_terms(ps, pe, ts, te, beta, eps):
    """Shared elementwise math: smooth-L1-bounded (loss_center, loss_interval)."""
    pred_center = (ps + pe) * 0.5
    pred_interval = pe - ps
    target_center = (ts + te) * 0.5
    target_interval = te - ts
    two_abs_d = 2.0 * jnp.abs(target_center - pred_center)
    loss_center = 1.0 - jnp.maximum(
        (target_interval - two_abs_d) * _recip(target_interval + two_abs_d + eps),
        0.0)
    loss_interval = 1.0 - jnp.minimum(
        target_interval * _recip(pred_interval + eps),
        pred_interval * _recip(target_interval + eps))
    half_beta = 0.5 * beta
    inv_2beta = 0.5 / beta       # hoisted constant: x*x*(0.5/beta)
    lc = jnp.where(loss_center < beta,
                   loss_center * loss_center * inv_2beta,
                   loss_center - half_beta)
    li = jnp.where(loss_interval < beta,
                   loss_interval * loss_interval * inv_2beta,
                   loss_interval - half_beta)
    return lc, li


# ----------------------------------------------------------------------------
# Kernel 1: per-block partial sums (mean / sum fast path, optionally weighted)
# ----------------------------------------------------------------------------
def _biou_sum_kernel(*refs, beta, eps, n, c, tile_c, weighted):
    if weighted:
        x_ref, w_ref, psum_ref = refs
    else:
        x_ref, psum_ref = refs
        w_ref = None
    j = pl.program_id(0)

    lc, li = _bounded_terms(x_ref[0 * SUBLANES:1 * SUBLANES, :],
                            x_ref[1 * SUBLANES:2 * SUBLANES, :],
                            x_ref[2 * SUBLANES:3 * SUBLANES, :],
                            x_ref[3 * SUBLANES:4 * SUBLANES, :],
                            beta, eps)
    if weighted:
        lc = lc * w_ref[0:SUBLANES, :]
        li = li * w_ref[SUBLANES:2 * SUBLANES, :]
    total = lc + li

    # Cheap mask of the zero-padded tail: element (row, col) is valid iff
    # row*c + col < n  <=>  col < n - row*c (per-row threshold).
    row = lax.broadcasted_iota(jnp.int32, (SUBLANES, 1), 0)
    thr = n - c * row                                            # (8, 1)
    col = lax.broadcasted_iota(jnp.int32, (SUBLANES, tile_c), 1) + j * tile_c
    psum_ref[0, 0] = jnp.sum(jnp.where(col < thr, total, 0.0))


def _bounded_iou_sum(pred, target, beta, eps, weight=None):
    """Scalar sum of all 2N (optionally weighted) bounded-IoU loss terms."""
    n = pred.shape[0]
    max_tile_c, min_grid = _tpu_defaults()
    n_pad, c, tile_c, grid = _choose_layout(n, max_tile_c, min_grid)

    weighted = weight is not None
    operands = [_pack_input_slab(pred, target, n_pad, c)]
    in_specs = [pl.BlockSpec((4 * SUBLANES, tile_c), lambda i: (0, i))]
    if weighted:
        operands.append(_pack_weight_slab(weight, n, n_pad, c))
        in_specs.append(pl.BlockSpec((2 * SUBLANES, tile_c), lambda i: (0, i)))

    kernel = functools.partial(_biou_sum_kernel, beta=float(beta),
                               eps=float(eps), n=n, c=c, tile_c=tile_c,
                               weighted=weighted)
    partial_sums = pl.pallas_call(
        kernel,
        out_shape=jax.ShapeDtypeStruct((grid, 1), jnp.float32),
        grid=(grid,),
        in_specs=in_specs,
        out_specs=pl.BlockSpec((1, 1), lambda i: (i, 0),
                               memory_space=pltpu.MemorySpace.SMEM),
        compiler_params=pltpu.CompilerParams(
            dimension_semantics=("parallel",)),
    )(*operands)
    return jnp.sum(partial_sums)


# ----------------------------------------------------------------------------
# Kernel 2: elementwise losses (reduction='none')
# ----------------------------------------------------------------------------
def _biou_elem_kernel(x_ref, out_ref, *, beta, eps):
    lc, li = _bounded_terms(x_ref[0 * SUBLANES:1 * SUBLANES, :],
                            x_ref[1 * SUBLANES:2 * SUBLANES, :],
                            x_ref[2 * SUBLANES:3 * SUBLANES, :],
                            x_ref[3 * SUBLANES:4 * SUBLANES, :],
                            beta, eps)
    out_ref[0:SUBLANES, :] = lc
    out_ref[SUBLANES:2 * SUBLANES, :] = li


def _bounded_iou_elem(pred, target, beta, eps):
    """(N, 2) per-element loss [loss_center, loss_interval]."""
    n = pred.shape[0]
    max_tile_c, min_grid = _tpu_defaults()
    n_pad, c, tile_c, grid = _choose_layout(n, max_tile_c, min_grid)
    slab = _pack_input_slab(pred, target, n_pad, c)

    kernel = functools.partial(_biou_elem_kernel, beta=float(beta),
                               eps=float(eps))
    out = pl.pallas_call(
        kernel,
        out_shape=jax.ShapeDtypeStruct((2 * SUBLANES, c), jnp.float32),
        grid=(grid,),
        in_specs=[pl.BlockSpec((4 * SUBLANES, tile_c), lambda i: (0, i))],
        out_specs=pl.BlockSpec((2 * SUBLANES, tile_c), lambda i: (0, i)),
        compiler_params=pltpu.CompilerParams(
            dimension_semantics=("parallel",)),
    )(slab)

    planes = out.reshape(2, n_pad)[:, :n]        # (2, N): [loss_center; loss_interval]
    # Materialize the (N, 2) layout the PyTorch module returns (one strided
    # interleave copy in XLA; required to match the reference output layout).
    return planes.T


# ----------------------------------------------------------------------------
# Module
# ----------------------------------------------------------------------------
class BoundedIoULoss:
    """JAX/Pallas port of the PyTorch BoundedIoULoss module (no parameters)."""

    def __init__(self, beta=0.2, eps=1e-3, reduction="mean", loss_weight=1.0):
        self.beta = beta
        self.eps = eps
        self.reduction = reduction
        self.loss_weight = loss_weight

    def __call__(self, pred, target, weight=None, avg_factor=None,
                 reduction_override=None):
        if weight is not None:
            # Data-dependent shortcut only when `weight` is concrete; under
            # jit (traced weight) we skip it instead of forcing a host sync.
            try:
                all_nonpos = not bool(jnp.any(jnp.asarray(weight) > 0))
            except jax.errors.ConcretizationTypeError:
                all_nonpos = False
            if all_nonpos:
                return (jnp.asarray(pred, jnp.float32)
                        * jnp.asarray(weight, jnp.float32)).sum()

        assert reduction_override in (None, "none", "mean", "sum")
        reduction = reduction_override if reduction_override else self.reduction
        n = pred.shape[0]

        if reduction in ("mean", "sum"):
            # Fast path (weighted or not): partial sums only, no HBM writeback
            # of the elementwise loss.
            total = _bounded_iou_sum(pred, target, self.beta, self.eps,
                                     weight=weight)
            if reduction == "sum":
                loss = total
            else:  # 'mean'
                denom = (2 * n) if avg_factor is None else avg_factor
                loss = total / denom
            return self.loss_weight * loss

        # reduction == 'none': elementwise kernel.
        loss_elem = _bounded_iou_elem(pred, target, self.beta, self.eps)  # (N, 2)
        if weight is not None:
            w = jnp.asarray(weight, jnp.float32)
            if w.ndim == 1:
                w = w[:, None]
            loss_elem = loss_elem * w
        return self.loss_weight * loss_elem


# ----------------------------------------------------------------------------
# Pure-JAX reference
# ----------------------------------------------------------------------------
def _reference_elem(pred, target, beta, eps):
    pred = jnp.asarray(pred, jnp.float32)
    target = jnp.asarray(target, jnp.float32)
    pred_center = (pred[:, 0] + pred[:, 1]) * 0.5
    pred_interval = pred[:, 1] - pred[:, 0]
    target_center = (target[:, 0] + target[:, 1]) * 0.5
    target_interval = target[:, 1] - target[:, 0]
    d_center = target_center - pred_center
    loss_center = 1 - jnp.maximum(
        (target_interval - 2 * jnp.abs(d_center))
        / (target_interval + 2 * jnp.abs(d_center) + eps),
        jnp.zeros_like(d_center))
    loss_interval = 1 - jnp.minimum(
        target_interval / (pred_interval + eps),
        pred_interval / (target_interval + eps))
    loss_comb = jnp.stack([loss_center, loss_interval], axis=-1).reshape(
        loss_center.shape[0], -1)
    loss = jnp.where(loss_comb < beta, 0.5 * loss_comb * loss_comb / beta,
                     loss_comb - 0.5 * beta)
    return loss  # (N, 2)


def _make_segments(key, n):
    k1, k2, k3, k4 = jax.random.split(key, 4)
    pred_start = jax.random.uniform(k1, (n,), jnp.float32, 0.0, 5.0)
    pred_len = jax.random.uniform(k2, (n,), jnp.float32, 0.1, 3.0)
    tgt_start = jax.random.uniform(k3, (n,), jnp.float32, 0.0, 5.0)
    tgt_len = jax.random.uniform(k4, (n,), jnp.float32, 0.1, 3.0)
    pred = jnp.stack([pred_start, pred_start + pred_len], axis=-1)    # (N, 2)
    target = jnp.stack([tgt_start, tgt_start + tgt_len], axis=-1)     # (N, 2)
    return pred, target


if __name__ == "__main__":
    key = jax.random.PRNGKey(0)
    k_seg, k_seg2, k_w = jax.random.split(key, 3)

    loss_mod = BoundedIoULoss(beta=0.2, eps=1e-3, reduction="mean",
                              loss_weight=1.0)

    # --- small case: N = 16 segments ---
    N = 16
    pred, target = _make_segments(k_seg, N)
    ref_elem = _reference_elem(pred, target, 0.2, 1e-3)

    out_mean = jax.block_until_ready(loss_mod(pred, target))
    assert jnp.allclose(out_mean, ref_elem.mean(), atol=1e-5, rtol=1e-5), \
        (out_mean, ref_elem.mean())

    out_sum = jax.block_until_ready(
        loss_mod(pred, target, reduction_override="sum"))
    assert jnp.allclose(out_sum, ref_elem.sum(), atol=1e-4, rtol=1e-5), \
        (out_sum, ref_elem.sum())

    out_none = jax.block_until_ready(
        loss_mod(pred, target, reduction_override="none"))
    assert out_none.shape == (N, 2)
    assert jnp.allclose(out_none, ref_elem, atol=1e-5, rtol=1e-5)

    # weighted mean / sum (exercise the weighted partial-sum fast path)
    w = jax.random.uniform(k_w, (N, 2), jnp.float32, 0.0, 2.0)
    ref_w = ref_elem * w
    out_wmean = jax.block_until_ready(loss_mod(pred, target, weight=w))
    assert jnp.allclose(out_wmean, ref_w.mean(), atol=1e-5, rtol=1e-5), \
        (out_wmean, ref_w.mean())
    out_wsum = jax.block_until_ready(
        loss_mod(pred, target, weight=w, reduction_override="sum"))
    assert jnp.allclose(out_wsum, ref_w.sum(), atol=1e-4, rtol=1e-5), \
        (out_wsum, ref_w.sum())

    # all-zero weight shortcut (concrete weight, no device-sync issue)
    w0 = jnp.zeros((N, 2), jnp.float32)
    out_zero = jax.block_until_ready(loss_mod(pred, target, weight=w0))
    assert jnp.allclose(out_zero, 0.0)

    # --- ragged case: N not a multiple of 8*128 (exercises the pad mask) ---
    N2 = 300
    pred2, target2 = _make_segments(k_seg2, N2)
    ref2 = _reference_elem(pred2, target2, 0.2, 1e-3)
    out2 = jax.block_until_ready(loss_mod(pred2, target2))
    assert jnp.allclose(out2, ref2.mean(), atol=1e-5, rtol=1e-5), \
        (out2, ref2.mean())

    print("KERNEL_OK")
</pallas_src>

<mosaic_0001>
module attributes {stable_mosaic.version = 11 : i64} {
  func.func @_biou_sum_kernel(%arg0: i32, %arg1: memref<32x128xf32, #tpu.memory_space<vmem>>, %arg2: memref<1x1xf32, #tpu.memory_space<smem>>) attributes {dimension_semantics = [#tpu.dimension_semantics<parallel>], iteration_bounds = array<i64: 1>, scalar_prefetch = 0 : i64, scratch_operands = 0 : i64, tpu.core_type = #tpu.core_type<tc>, window_params = [{transform_indices = @transform_0, window_bounds = array<i64: 32, 128>}, {transform_indices = @transform_1, window_bounds = array<i64: 1, 1>}]} {
    %c0 = arith.constant 0 : index
    %c0_0 = arith.constant 0 : index
    %0 = vector.load %arg1[%c0, %c0_0] : memref<32x128xf32, #tpu.memory_space<vmem>>, vector<8x128xf32>
    %c8 = arith.constant 8 : index
    %c0_1 = arith.constant 0 : index
    %1 = vector.load %arg1[%c8, %c0_1] : memref<32x128xf32, #tpu.memory_space<vmem>>, vector<8x128xf32>
    %c16 = arith.constant 16 : index
    %c0_2 = arith.constant 0 : index
    %2 = vector.load %arg1[%c16, %c0_2] : memref<32x128xf32, #tpu.memory_space<vmem>>, vector<8x128xf32>
    %c24 = arith.constant 24 : index
    %c0_3 = arith.constant 0 : index
    %3 = vector.load %arg1[%c24, %c0_3] : memref<32x128xf32, #tpu.memory_space<vmem>>, vector<8x128xf32>
    %4 = arith.addf %0, %1 : vector<8x128xf32>
    %cst = arith.constant 5.000000e-01 : f32
    %5 = vector.broadcast %cst : f32 to vector<8x128xf32>
    %6 = arith.mulf %4, %5 : vector<8x128xf32>
    %7 = arith.subf %1, %0 : vector<8x128xf32>
    %8 = arith.addf %2, %3 : vector<8x128xf32>
    %cst_4 = arith.constant 5.000000e-01 : f32
    %9 = vector.broadcast %cst_4 : f32 to vector<8x128xf32>
    %10 = arith.mulf %8, %9 : vector<8x128xf32>
    %11 = arith.subf %3, %2 : vector<8x128xf32>
    %12 = arith.subf %10, %6 : vector<8x128xf32>
    %13 = math.absf %12 : vector<8x128xf32>
    %cst_5 = arith.constant 2.000000e+00 : f32
    %14 = vector.broadcast %cst_5 : f32 to vector<8x128xf32>
    %15 = arith.mulf %14, %13 : vector<8x128xf32>
    %16 = arith.subf %11, %15 : vector<8x128xf32>
    %17 = arith.addf %11, %15 : vector<8x128xf32>
    %cst_6 = arith.constant 1.000000e-03 : f32
    %18 = vector.broadcast %cst_6 : f32 to vector<8x128xf32>
    %19 = arith.addf %17, %18 : vector<8x128xf32>
    %20 = tpu.reciprocal %19 {approx = true} : vector<8x128xf32> -> vector<8x128xf32>
    %21 = arith.mulf %19, %20 : vector<8x128xf32>
    %cst_7 = arith.constant 2.000000e+00 : f32
    %22 = vector.broadcast %cst_7 : f32 to vector<8x128xf32>
    %23 = arith.subf %22, %21 : vector<8x128xf32>
    %24 = arith.mulf %20, %23 : vector<8x128xf32>
    %25 = arith.mulf %16, %24 : vector<8x128xf32>
    %cst_8 = arith.constant 0.000000e+00 : f32
    %26 = vector.broadcast %cst_8 : f32 to vector<8x128xf32>
    %27 = arith.maximumf %25, %26 : vector<8x128xf32>
    %cst_9 = arith.constant 1.000000e+00 : f32
    %28 = vector.broadcast %cst_9 : f32 to vector<8x128xf32>
    %29 = arith.subf %28, %27 : vector<8x128xf32>
    %cst_10 = arith.constant 1.000000e-03 : f32
    %30 = vector.broadcast %cst_10 : f32 to vector<8x128xf32>
    %31 = arith.addf %7, %30 : vector<8x128xf32>
    %32 = tpu.reciprocal %31 {approx = true} : vector<8x128xf32> -> vector<8x128xf32>
    %33 = arith.mulf %31, %32 : vector<8x128xf32>
    %cst_11 = arith.constant 2.000000e+00 : f32
    %34 = vector.broadcast %cst_11 : f32 to vector<8x128xf32>
    %35 = arith.subf %34, %33 : vector<8x128xf32>
    %36 = arith.mulf %32, %35 : vector<8x128xf32>
    %37 = arith.mulf %11, %36 : vector<8x128xf32>
    %cst_12 = arith.constant 1.000000e-03 : f32
    %38 = vector.broadcast %cst_12 : f32 to vector<8x128xf32>
    %39 = arith.addf %11, %38 : vector<8x128xf32>
    %40 = tpu.reciprocal %39 {approx = true} : vector<8x128xf32> -> vector<8x128xf32>
    %41 = arith.mulf %39, %40 : vector<8x128xf32>
    %cst_13 = arith.constant 2.000000e+00 : f32
    %42 = vector.broadcast %cst_13 : f32 to vector<8x128xf32>
    %43 = arith.subf %42, %41 : vector<8x128xf32>
    %44 = arith.mulf %40, %43 : vector<8x128xf32>
    %45 = arith.mulf %7, %44 : vector<8x128xf32>
    %46 = arith.minimumf %37, %45 : vector<8x128xf32>
    %cst_14 = arith.constant 1.000000e+00 : f32
    %47 = vector.broadcast %cst_14 : f32 to vector<8x128xf32>
    %48 = arith.subf %47, %46 : vector<8x128xf32>
    %cst_15 = arith.constant 2.000000e-01 : f32
    %49 = vector.broadcast %cst_15 : f32 to vector<8x128xf32>
    %50 = arith.cmpf olt, %29, %49 : vector<8x128xf32>
    %51 = arith.mulf %29, %29 : vector<8x128xf32>
    %cst_16 = arith.constant 2.500000e+00 : f32
    %52 = vector.broadcast %cst_16 : f32 to vector<8x128xf32>
    %53 = arith.mulf %51, %52 : vector<8x128xf32>
    %cst_17 = arith.constant 1.000000e-01 : f32
    %54 = vector.broadcast %cst_17 : f32 to vector<8x128xf32>
    %55 = arith.subf %29, %54 : vector<8x128xf32>
    %56 = arith.select %50, %53, %55 : vector<8x128xi1>, vector<8x128xf32>
    %cst_18 = arith.constant 2.000000e-01 : f32
    %57 = vector.broadcast %cst_18 : f32 to vector<8x128xf32>
    %58 = arith.cmpf olt, %48, %57 : vector<8x128xf32>
    %59 = arith.mulf %48, %48 : vector<8x128xf32>
    %cst_19 = arith.constant 2.500000e+00 : f32
    %60 = vector.broadcast %cst_19 : f32 to vector<8x128xf32>
    %61 = arith.mulf %59, %60 : vector<8x128xf32>
    %cst_20 = arith.constant 1.000000e-01 : f32
    %62 = vector.broadcast %cst_20 : f32 to vector<8x128xf32>
    %63 = arith.subf %48, %62 : vector<8x128xf32>
    %64 = arith.select %58, %61, %63 : vector<8x128xi1>, vector<8x128xf32>
    %65 = arith.addf %56, %64 : vector<8x128xf32>
    %66 = tpu.iota {dimensions = array<i32: 0>} : vector<8x1xi32>
    %c128_i32 = arith.constant 128 : i32
    %67 = vector.broadcast %c128_i32 : i32 to vector<8x1xi32>
    %68 = arith.muli %67, %66 : vector<8x1xi32>
    %c16_i32 = arith.constant 16 : i32
    %69 = vector.broadcast %c16_i32 : i32 to vector<8x1xi32>
    %70 = arith.subi %69, %68 : vector<8x1xi32>
    %71 = tpu.iota {dimensions = array<i32: 1>} : vector<8x128xi32>
    %c128_i32_21 = arith.constant 128 : i32
    %72 = arith.muli %arg0, %c128_i32_21 : i32
    %73 = vector.broadcast %72 : i32 to vector<8x128xi32>
    %74 = arith.addi %71, %73 : vector<8x128xi32>
    %75 = vector.broadcast %70 : vector<8x1xi32> to vector<8x128xi32>
    %76 = arith.cmpi slt, %74, %75 : vector<8x128xi32>
    %cst_22 = arith.constant 0.000000e+00 : f32
    %77 = vector.broadcast %cst_22 : f32 to vector<8x128xf32>
    %78 = arith.select %76, %65, %77 : vector<8x128xi1>, vector<8x128xf32>
    %79 = vector.shape_cast %78 : vector<8x128xf32> to vector<1x8x128xf32>
    %cst_23 = arith.constant dense<0.000000e+00> : vector<1xf32>
    %80 = vector.multi_reduction <add>, %79, %cst_23 [1, 2] : vector<1x8x128xf32> to vector<1xf32>
    %81 = vector.shape_cast %80 : vector<1xf32> to vector<1x1x1xf32>
    %82 = vector.extract %81[0, 0, 0] : f32 from vector<1x1x1xf32>
    %c0_24 = arith.constant 0 : index
    %c0_25 = arith.constant 0 : index
    %83 = memref.load %arg2[%c0_24, %c0_25] : memref<1x1xf32, #tpu.memory_space<smem>>
    memref.store %82, %arg2[%c0_24, %c0_25] : memref<1x1xf32, #tpu.memory_space<smem>>
    return
  }
  func.func @transform_0(%arg0: i32) -> (i32, i32) {
    %c0_i32 = arith.constant 0 : i32
    %c0_i32_0 = arith.constant 0 : i32
    return %c0_i32, %arg0 : i32, i32
  }
  func.func @transform_1(%arg0: i32) -> (i32, i32) {
    %c0_i32 = arith.constant 0 : i32
    %c0_i32_0 = arith.constant 0 : i32
    return %arg0, %c0_i32 : i32, i32
  }
}

</mosaic_0001>

<bundles_post_ra>
// kernel: tpu_custom_call.1
= control target key start
LH: loop header
LB: loop body
LE: loop exit
PB: predicated region body
PF: predicated region fallthrough
CT: control target
= control target key end

     0   :  { %6 = vsyncpa [#allocation3], 0  ;;  %s173_s0 = inlined_call_operand.hbm [shape: f32[32,128], index: 0, kind: input, shape index: {}]   ;;  %s174_s1 = inlined_call_operand.hbm [shape: f32[1,1], index: 1, kind: output, shape index: {}]  }
   0x1   :  { %7 = vsyncpa [#allocation4], 0  ;;  %s153_s6 = smov [#allocation2]  }
   0x2   :  { %s13_s7 = sshll.u32 %s153_s6, 4  ;;  %s14_s7 = int_to_ptr.vmem [resolvable:$true] %s13_s7 }
   0x3   :  { %s129_s8 = scalar_lea.vmem %s14_s7, 512  ;;  %p134_p1 = scmp.lt.s32.totalorder %s14_s7, %s14_s7 }
   0x4   :  { %p130_p0 = scmp.ne.s32.totalorder %s14_s7, %s129_s8  ;;  %p135_p2 = scmp.lt.s32.totalorder %s129_s8, %s129_s8 }
   0x6   :  { %p136_p3 = por %p135_p2, %p134_p1 }
   0x8   :  { %p137_p4 = pnand %p136_p3, %p130_p0 }
   0xa   :  { %140 = shalt.err (!%p137_p4)
}
   0xb   :  { %s154_s9 = smov 128   ;;  %s155_s10 = smov 8  }
   0xc   :  { %19 = dma.hbm_to_vmem [thread:$0]  %s173_s0, 512, %s14_s7, [#allocation3], %s154_s9, %s154_s9, %s155_s10  }
   0xd   :  { %149 = dma.done.wait [#allocation3], 512  }
   0xe   :  { %150 = vsyncadd [#allocation3], 4294966784  ;;  %v23_v0 = vld [vmem:[#allocation2] sm:$0xff]  ;;  %v24_v1 = vld [vmem:[#allocation2 + $0x8] sm:$0xff]  ;;  %v71_v30 = vlaneseq  ;;  %s156_s13 = smov [#allocation5]  }
   0xf   :  { %v25_v2 = vld [vmem:[#allocation2 + $0x10] sm:$0xff]  ;;  %v26_v3 = vld [vmem:[#allocation2 + $0x18] sm:$0xff]  ;;  %v27_v4 = vadd.f32 %v24_v1, %v23_v0  ;;  %v29_v5 = vsub.f32 %v24_v1, %v23_v0 }
  0x10   :  { %v30_v6 = vadd.f32 %v26_v3, %v25_v2  ;;  %v32_v7 = vsub.f32 %v26_v3, %v25_v2  ;;  %v72_v35 = vshrl.u32 %v71_v30, 7  ;;  %v76_v46 = vand.u32 127, %v71_v30 }
  0x11   :  { %v28_v8 = vmul.f32 0.5, %v27_v4  ;;  %v46_v9 = vadd.f32 0.001, %v29_v5 }
  0x12   :  { %v31_v10 = vmul.f32 0.5, %v30_v6  ;;  %v52_v11 = vadd.f32 0.001, %v32_v7  ;;  %v73_v39 = vmul.u32 128, %v72_v35 }
  0x13   :  { %115 = vrcp.f32 %v46_v9 }
  0x14   :  { %v33_v12 = vsub.f32 %v31_v10, %v28_v8  ;;  %117 = vrcp.f32 %v52_v11  ;;  %v74_v45 = vsub.s32 16, %v73_v39 }
  0x16   :  { %v34_v13 = vand.u32 2147483647, %v33_v12  ;;  %vm80_vm2 = vcmp.lt.s32.totalorder %v76_v46, %v74_v45 }
  0x18   :  { %v35_v14 = vmul.f32 2.0, %v34_v13 }
  0x1a   :  { %v37_v15 = vadd.f32 %v35_v14, %v32_v7  ;;  %v36_v31 = vsub.f32 %v32_v7, %v35_v14 }
  0x1c   :  { %v38_v16 = vadd.f32 0.001, %v37_v15 }
  0x1e   :  { %119 = vrcp.f32 %v38_v16 }
  0x20   :  { %v116_v17 = vpop.eup %115 }
  0x21   :  { %v118_v18 = vpop.eup %117  ;;  %v48_v19 = vmul.f32 %v116_v17, %v46_v9 }
  0x22   :  { %v54_v20 = vmul.f32 %v118_v18, %v52_v11 }
  0x23   :  { %v49_v21 = vsub.f32 2.0, %v48_v19 }
  0x24   :  { %v55_v22 = vsub.f32 2.0, %v54_v20 }
  0x25   :  { %v50_v23 = vmul.f32 %v116_v17, %v49_v21 }
  0x26   :  { %v56_v24 = vmul.f32 %v118_v18, %v55_v22 }
  0x27   :  { %v51_v25 = vmul.f32 %v50_v23, %v32_v7 }
  0x28   :  { %v57_v26 = vmul.f32 %v56_v24, %v29_v5 }
  0x2a   :  { %v58_v27 = vmin.f32 %v51_v25, %v57_v26 }
  0x2b   :  { %v120_v28 = vpop.eup %119 }
  0x2c   :  { %v40_v29 = vmul.f32 %v120_v28, %v38_v16  ;;  %v59_v33 = vsub.f32 1.0, %v58_v27 }
  0x2e   :  { %v41_v32 = vsub.f32 2.0, %v40_v29  ;;  %v66_v37 = vmul.f32 %v59_v33, %v59_v33  ;;  %v108_v42 = vadd.f32 -0.1, %v59_v33  ;;  %vm65_vm0 = vcmp.lt.f32.partialorder %v59_v33, 0.2 }
  0x30   :  { %v42_v34 = vmul.f32 %v120_v28, %v41_v32  ;;  %v67_v41 = vmul.f32 2.5, %v66_v37 }
  0x32   :  { %v43_v36 = vmul.f32 %v42_v34, %v36_v31  ;;  %v69_v48 = vsel %vm65_vm0, %v67_v41, %v108_v42 }
  0x34   :  { %v44_v38 = vmax.f32 %v43_v36, 0.0 }
  0x36   :  { %v45_v40 = vsub.f32 1.0, %v44_v38 }
  0x38   :  { %v61_v43 = vmul.f32 %v45_v40, %v45_v40  ;;  %v107_v44 = vadd.f32 -0.1, %v45_v40  ;;  %vm60_vm1 = vcmp.lt.f32.partialorder %v45_v40, 0.2 }
  0x3a   :  { %v62_v47 = vmul.f32 2.5, %v61_v43 }
  0x3c   :  { %v64_v49 = vsel %vm60_vm1, %v62_v47, %v107_v44 }
  0x3d   :  { %v70_v50 = vadd.f32 %v69_v48, %v64_v49 }
  0x3f   :  { %v81_v51 = vsel %vm80_vm2, %v70_v50, 0.0 }
  0x40   :  { %82 = vadd.xlane.f32.xlu0 %v81_v51 }
  0xc9   :  { %v83_v52 = vpop.xlane.xlu0 %82 }
  0xca   :  { %v84_v53 = vrot.slane %v83_v52, 4 }
  0xcc   :  { %v85_v54 = vadd.f32 %v84_v53, %v83_v52 }
  0xce   :  { %v86_v55 = vrot.slane %v85_v54, 2 }
  0xd0   :  { %v87_v56 = vadd.f32 %v86_v55, %v85_v54 }
  0xd2   :  { %v88_v57 = vrot.slane %v87_v56, 1 }
  0xd4   :  { %v89_v58 = vadd.f32 %v88_v57, %v87_v56 }
  0xd6   :  { %109 = vpush %v89_v58 }
 0x107   :  { %s110_s0 = spop %109 }
 0x108   :  { %92 = sst [smem:[#allocation5]] %s110_s0 }
 0x109   :  { %100 = dma.smem_to_hbm %s156_s13, 16, %s174_s1, [#allocation4]  }
 0x10a   :  { %151 = dma.done.wait [#allocation4], 16  }
 0x10b   :  { %152 = vsyncadd [#allocation4], 4294967280 }
 0x10c   :  { %104 = sfence }
 0x10d   :  { %105 = vsyncpa [#allocation3], 1 }
 0x10e   :  { %106 = vsyncpa [#allocation4], 1 }

</bundles_post_ra>
